<compile_context>
chip_gen: v5e
topology: v5e:2x2
jax: 0.10.0
libtpu: 0.0.40
codegen_flags: <defaults>
</compile_context>

<pallas_src>
import functools

import jax
import jax.numpy as jnp
from jax.experimental import pallas as pl
from jax.experimental.pallas import tpu as pltpu

LANE = 128
SUBLANE = 8


def _round_up(x, m):
    return ((x + m - 1) // m) * m


# ----------------------------------------------------------------------------
# Fused forward kernel: one invocation, everything VMEM-resident.
# ----------------------------------------------------------------------------
def _fused_gcn_kernel(x_ref, a_ref, p_ref, w_ref, b_ref, lw_ref, lb_ref,
                      out_ref, *, num_nodes):
    num_layers = w_ref.shape[0]                    # static
    npad, hpad = x_ref.shape
    bpad = out_ref.shape[0]

    a = a_ref[...]                                 # [Npad, Npad] bf16
    p = p_ref[...]                                 # [Bpad, Npad] bf16

    # Pad-row mask: padded node rows would otherwise hold relu(bias) != 0
    # after the epilogue (review correctness concern #2).
    row_mask = (jax.lax.broadcasted_iota(jnp.int32, (npad, hpad), 0)
                < num_nodes)

    # lin1 bias folded into the accumulator init (no trailing add).
    out = jnp.broadcast_to(lb_ref[...], (bpad, hpad)).astype(jnp.float32)

    h = x_ref[...]                                 # [Npad, Hpad] bf16 (layer-0 input)
    for l in range(num_layers):                    # static unroll
        # Uniform per-layer compute: relu((A_hat @ H) @ W + b), f32 accumulation.
        ah = jnp.dot(a, h, preferred_element_type=jnp.float32)
        hw = jnp.dot(ah.astype(jnp.bfloat16), w_ref[l],
                     preferred_element_type=jnp.float32)
        h_f32 = jnp.where(row_mask, jnp.maximum(hw + b_ref[l], 0.0), 0.0)
        h = h_f32.astype(jnp.bfloat16)             # cast once, reused twice

        # global_add_pool contribution of this layer, fed straight into its
        # lin1 block.  Pooled stays f32 and lin1 weights are f32 (tiny matmul,
        # tighter numerics).
        pooled_l = jnp.dot(p, h, preferred_element_type=jnp.float32)
        out = out + jnp.dot(pooled_l, lw_ref[l],
                            preferred_element_type=jnp.float32)

    out_ref[...] = jnp.maximum(out, 0.0)
    # TODO(synk): nn.Dropout(p=0.5) is eval-mode identity (no RNG masking).


def gcn_forward_fused(x_pad, a_pad, p_pad, w_stack, b_stack, lw_stack, lb_pad,
                      *, num_nodes):
    bpad = p_pad.shape[0]
    hpad = w_stack.shape[-1]
    kernel = functools.partial(_fused_gcn_kernel, num_nodes=num_nodes)
    vmem_spec = lambda: pl.BlockSpec(memory_space=pltpu.MemorySpace.VMEM)
    return pl.pallas_call(
        kernel,
        out_shape=jax.ShapeDtypeStruct((bpad, hpad), jnp.float32),
        in_specs=[vmem_spec() for _ in range(7)],
        out_specs=vmem_spec(),
    )(x_pad, a_pad, p_pad, w_stack, b_stack, lw_stack, lb_pad)


# ----------------------------------------------------------------------------
# Plain-JAX glue: normalized adjacency, pooling matrix, params, padding
# ----------------------------------------------------------------------------
def normalized_adjacency(edge_index, num_nodes):
    """A_hat = D^-1/2 (A + I) D^-1/2, matching PyG GCNConv gcn_norm."""
    src, dst = edge_index[0], edge_index[1]
    a = jnp.zeros((num_nodes, num_nodes), jnp.float32)
    a = a.at[dst, src].add(1.0)
    a = a + jnp.eye(num_nodes, dtype=jnp.float32)
    deg = a.sum(axis=1)
    dinv = jax.lax.rsqrt(jnp.maximum(deg, 1e-12))
    return a * dinv[:, None] * dinv[None, :]


def pooling_matrix(batch, num_graphs):
    return (batch[None, :] == jnp.arange(num_graphs)[:, None]).astype(jnp.float32)


def glorot(key, fan_in, fan_out):
    limit = jnp.sqrt(6.0 / (fan_in + fan_out))
    return jax.random.uniform(key, (fan_in, fan_out), jnp.float32, -limit, limit)


def init_params(key, num_features, hidden, num_layers):
    params = {}
    keys = jax.random.split(key, num_layers + 1)
    params["conv_w"] = [glorot(keys[0], num_features, hidden)]
    params["conv_b"] = [jnp.zeros((1, hidden), jnp.float32)]
    for i in range(1, num_layers):
        params["conv_w"].append(glorot(keys[i], hidden, hidden))
        params["conv_b"].append(jnp.zeros((1, hidden), jnp.float32))
    k_w, k_b = jax.random.split(keys[num_layers])
    in_dim = num_layers * hidden
    bound = 1.0 / jnp.sqrt(in_dim)
    params["lin1_w"] = jax.random.uniform(k_w, (in_dim, hidden), jnp.float32, -bound, bound)
    params["lin1_b"] = jax.random.uniform(k_b, (1, hidden), jnp.float32, -bound, bound)
    return params


def prepare_inputs(params, x, a_hat, batch, num_graphs):
    n, c = x.shape
    hidden = params["conv_w"][0].shape[1]
    num_layers = len(params["conv_w"])

    hpad = _round_up(max(c, hidden, LANE), LANE)
    npad = _round_up(max(n, LANE), LANE)
    bpad = _round_up(max(num_graphs, SUBLANE), SUBLANE)

    x_pad = jnp.zeros((npad, hpad), jnp.bfloat16).at[:n, :c].set(x.astype(jnp.bfloat16))
    a_pad = jnp.zeros((npad, npad), jnp.bfloat16).at[:n, :n].set(a_hat.astype(jnp.bfloat16))
    p = pooling_matrix(batch, num_graphs)
    p_pad = jnp.zeros((bpad, npad), jnp.bfloat16).at[:num_graphs, :n].set(p.astype(jnp.bfloat16))

    w_stack = jnp.zeros((num_layers, hpad, hpad), jnp.bfloat16)
    b_stack = jnp.zeros((num_layers, 1, hpad), jnp.float32)
    for l in range(num_layers):
        w = params["conv_w"][l]
        b = params["conv_b"][l]
        w_stack = w_stack.at[l, :w.shape[0], :w.shape[1]].set(w.astype(jnp.bfloat16))
        b_stack = b_stack.at[l, 0, :b.shape[1]].set(b[0])

    # lin1 weight kept in f32 (tiny matmul; tightens final numerics).
    lw = params["lin1_w"]                                  # [L*H, H]
    lw_stack = jnp.zeros((num_layers, hpad, hpad), jnp.float32)
    for l in range(num_layers):
        blk = lw[l * hidden:(l + 1) * hidden, :]
        lw_stack = lw_stack.at[l, :hidden, :hidden].set(blk)
    lb_pad = jnp.zeros((1, hpad), jnp.float32).at[0, :hidden].set(params["lin1_b"][0])

    return x_pad, a_pad, p_pad, w_stack, b_stack, lw_stack, lb_pad


def gcn_forward(params, x, a_hat, batch, num_graphs):
    hidden = params["conv_w"][0].shape[1]
    n = x.shape[0]
    padded = prepare_inputs(params, x, a_hat, batch, num_graphs)
    out_pad = gcn_forward_fused(*padded, num_nodes=n)
    return out_pad[:num_graphs, :hidden]


def gcn_forward_ref(params, x, a_hat, batch, num_graphs):
    """Pure-JAX f32 reference for validation."""
    pool_mat = pooling_matrix(batch, num_graphs)
    h = x
    xs = []
    for w, b in zip(params["conv_w"], params["conv_b"]):
        h = jnp.maximum(a_hat @ (h @ w) + b, 0.0)
        xs.append(h)
    pooled = pool_mat @ jnp.concatenate(xs, axis=1)
    return jnp.maximum(pooled @ params["lin1_w"] + params["lin1_b"], 0.0)


# ----------------------------------------------------------------------------
# Main
# ----------------------------------------------------------------------------
if __name__ == "__main__":
    key = jax.random.PRNGKey(0)

    num_nodes = 32          # two graphs of 16 nodes each
    num_features = 8        # dataset.num_features
    hidden = 32
    num_layers = 3
    num_graphs = 2

    k_x, k_p = jax.random.split(key)

    x = jax.random.normal(k_x, (num_nodes, num_features), jnp.float32)

    # edge_index: a bidirectional ring inside each of the two graphs
    src_list, dst_list = [], []
    for g in range(num_graphs):
        base = g * (num_nodes // num_graphs)
        n_g = num_nodes // num_graphs
        s = jnp.arange(n_g) + base
        d = (jnp.arange(n_g) + 1) % n_g + base
        src_list += [s, d]
        dst_list += [d, s]
    edge_index = jnp.stack([jnp.concatenate(src_list), jnp.concatenate(dst_list)])

    batch = jnp.repeat(jnp.arange(num_graphs), num_nodes // num_graphs)

    a_hat = normalized_adjacency(edge_index, num_nodes)
    params = init_params(k_p, num_features, hidden, num_layers)

    out = gcn_forward(params, x, a_hat, batch, num_graphs)
    jax.block_until_ready(out)

    assert out.shape == (num_graphs, hidden)
    assert bool(jnp.all(jnp.isfinite(out)))

    ref = gcn_forward_ref(params, x, a_hat, batch, num_graphs)
    assert bool(jnp.allclose(out, ref, rtol=1e-1, atol=2.5e-1)), \
        float(jnp.max(jnp.abs(out - ref)))

    print("KERNEL_OK")
</pallas_src>

<mosaic_0001>
module attributes {stable_mosaic.version = 11 : i64} {
  func.func @_fused_gcn_kernel(%arg0: memref<128x128xbf16, #tpu.memory_space<vmem>>, %arg1: memref<128x128xbf16, #tpu.memory_space<vmem>>, %arg2: memref<8x128xbf16, #tpu.memory_space<vmem>>, %arg3: memref<3x128x128xbf16, #tpu.memory_space<vmem>>, %arg4: memref<3x1x128xf32, #tpu.memory_space<vmem>>, %arg5: memref<3x128x128xf32, #tpu.memory_space<vmem>>, %arg6: memref<1x128xf32, #tpu.memory_space<vmem>>, %arg7: memref<8x128xf32, #tpu.memory_space<vmem>>) attributes {dimension_semantics = [], scalar_prefetch = 0 : i64, scratch_operands = 0 : i64, tpu.core_type = #tpu.core_type<tc>} {
    %c0 = arith.constant 0 : index
    %c0_0 = arith.constant 0 : index
    %0 = vector.load %arg1[%c0, %c0_0] : memref<128x128xbf16, #tpu.memory_space<vmem>>, vector<128x128xbf16>
    %c0_1 = arith.constant 0 : index
    %c0_2 = arith.constant 0 : index
    %1 = vector.load %arg2[%c0_1, %c0_2] : memref<8x128xbf16, #tpu.memory_space<vmem>>, vector<8x128xbf16>
    %2 = tpu.iota {dimensions = array<i32: 0>} : vector<128x128xi32>
    %c32_i32 = arith.constant 32 : i32
    %3 = vector.broadcast %c32_i32 : i32 to vector<128x128xi32>
    %4 = arith.cmpi slt, %2, %3 : vector<128x128xi32>
    %c0_3 = arith.constant 0 : index
    %c0_4 = arith.constant 0 : index
    %5 = vector.load %arg6[%c0_3, %c0_4] : memref<1x128xf32, #tpu.memory_space<vmem>>, vector<1x128xf32>
    %6 = vector.shape_cast %5 : vector<1x128xf32> to vector<1x128xf32>
    %7 = vector.broadcast %6 : vector<1x128xf32> to vector<8x128xf32>
    %c0_5 = arith.constant 0 : index
    %c0_6 = arith.constant 0 : index
    %8 = vector.load %arg0[%c0_5, %c0_6] : memref<128x128xbf16, #tpu.memory_space<vmem>>, vector<128x128xbf16>
    %cst = arith.constant dense<0.000000e+00> : vector<128x128xf32>
    %9 = tpu.matmul %0, %8, %cst {dimension_numbers = #tpu.dot_dimension_numbers<[1], [0], [0], [1], [0, 0, 1, 1], [], []>} : vector<128x128xbf16>, vector<128x128xbf16>, vector<128x128xf32> -> vector<128x128xf32>
    %10 = arith.truncf %9 : vector<128x128xf32> to vector<128x128xbf16>
    %c0_7 = arith.constant 0 : index
    %c0_8 = arith.constant 0 : index
    %c0_9 = arith.constant 0 : index
    %11 = vector.load %arg3[%c0_7, %c0_8, %c0_9] : memref<3x128x128xbf16, #tpu.memory_space<vmem>>, vector<1x128x128xbf16>
    %12 = vector.shape_cast %11 : vector<1x128x128xbf16> to vector<128x128xbf16>
    %cst_10 = arith.constant dense<0.000000e+00> : vector<128x128xf32>
    %13 = tpu.matmul %10, %12, %cst_10 {dimension_numbers = #tpu.dot_dimension_numbers<[1], [0], [0], [1], [0, 0, 1, 1], [], []>} : vector<128x128xbf16>, vector<128x128xbf16>, vector<128x128xf32> -> vector<128x128xf32>
    %c0_11 = arith.constant 0 : index
    %c0_12 = arith.constant 0 : index
    %c0_13 = arith.constant 0 : index
    %14 = vector.load %arg4[%c0_11, %c0_12, %c0_13] : memref<3x1x128xf32, #tpu.memory_space<vmem>>, vector<1x1x128xf32>
    %15 = vector.shape_cast %14 : vector<1x1x128xf32> to vector<1x128xf32>
    %16 = vector.broadcast %15 : vector<1x128xf32> to vector<128x128xf32>
    %17 = arith.addf %13, %16 : vector<128x128xf32>
    %cst_14 = arith.constant 0.000000e+00 : f32
    %18 = vector.broadcast %cst_14 : f32 to vector<128x128xf32>
    %19 = arith.maximumf %17, %18 : vector<128x128xf32>
    %cst_15 = arith.constant 0.000000e+00 : f32
    %20 = vector.broadcast %cst_15 : f32 to vector<128x128xf32>
    %21 = arith.select %4, %19, %20 : vector<128x128xi1>, vector<128x128xf32>
    %22 = arith.truncf %21 : vector<128x128xf32> to vector<128x128xbf16>
    %cst_16 = arith.constant dense<0.000000e+00> : vector<8x128xf32>
    %23 = tpu.matmul %1, %22, %cst_16 {dimension_numbers = #tpu.dot_dimension_numbers<[1], [0], [0], [1], [0, 0, 1, 1], [], []>} : vector<8x128xbf16>, vector<128x128xbf16>, vector<8x128xf32> -> vector<8x128xf32>
    %c0_17 = arith.constant 0 : index
    %c0_18 = arith.constant 0 : index
    %c0_19 = arith.constant 0 : index
    %24 = vector.load %arg5[%c0_17, %c0_18, %c0_19] : memref<3x128x128xf32, #tpu.memory_space<vmem>>, vector<1x128x128xf32>
    %25 = vector.shape_cast %24 : vector<1x128x128xf32> to vector<128x128xf32>
    %cst_20 = arith.constant dense<0.000000e+00> : vector<8x128xf32>
    %26 = tpu.matmul %23, %25, %cst_20 {dimension_numbers = #tpu.dot_dimension_numbers<[1], [0], [0], [1], [0, 0, 1, 1], [], []>} : vector<8x128xf32>, vector<128x128xf32>, vector<8x128xf32> -> vector<8x128xf32>
    %27 = arith.addf %7, %26 : vector<8x128xf32>
    %cst_21 = arith.constant dense<0.000000e+00> : vector<128x128xf32>
    %28 = tpu.matmul %0, %22, %cst_21 {dimension_numbers = #tpu.dot_dimension_numbers<[1], [0], [0], [1], [0, 0, 1, 1], [], []>} : vector<128x128xbf16>, vector<128x128xbf16>, vector<128x128xf32> -> vector<128x128xf32>
    %29 = arith.truncf %28 : vector<128x128xf32> to vector<128x128xbf16>
    %c1 = arith.constant 1 : index
    %c0_22 = arith.constant 0 : index
    %c0_23 = arith.constant 0 : index
    %30 = vector.load %arg3[%c1, %c0_22, %c0_23] : memref<3x128x128xbf16, #tpu.memory_space<vmem>>, vector<1x128x128xbf16>
    %31 = vector.shape_cast %30 : vector<1x128x128xbf16> to vector<128x128xbf16>
    %cst_24 = arith.constant dense<0.000000e+00> : vector<128x128xf32>
    %32 = tpu.matmul %29, %31, %cst_24 {dimension_numbers = #tpu.dot_dimension_numbers<[1], [0], [0], [1], [0, 0, 1, 1], [], []>} : vector<128x128xbf16>, vector<128x128xbf16>, vector<128x128xf32> -> vector<128x128xf32>
    %c1_25 = arith.constant 1 : index
    %c0_26 = arith.constant 0 : index
    %c0_27 = arith.constant 0 : index
    %33 = vector.load %arg4[%c1_25, %c0_26, %c0_27] : memref<3x1x128xf32, #tpu.memory_space<vmem>>, vector<1x1x128xf32>
    %34 = vector.shape_cast %33 : vector<1x1x128xf32> to vector<1x128xf32>
    %35 = vector.broadcast %34 : vector<1x128xf32> to vector<128x128xf32>
    %36 = arith.addf %32, %35 : vector<128x128xf32>
    %cst_28 = arith.constant 0.000000e+00 : f32
    %37 = vector.broadcast %cst_28 : f32 to vector<128x128xf32>
    %38 = arith.maximumf %36, %37 : vector<128x128xf32>
    %cst_29 = arith.constant 0.000000e+00 : f32
    %39 = vector.broadcast %cst_29 : f32 to vector<128x128xf32>
    %40 = arith.select %4, %38, %39 : vector<128x128xi1>, vector<128x128xf32>
    %41 = arith.truncf %40 : vector<128x128xf32> to vector<128x128xbf16>
    %cst_30 = arith.constant dense<0.000000e+00> : vector<8x128xf32>
    %42 = tpu.matmul %1, %41, %cst_30 {dimension_numbers = #tpu.dot_dimension_numbers<[1], [0], [0], [1], [0, 0, 1, 1], [], []>} : vector<8x128xbf16>, vector<128x128xbf16>, vector<8x128xf32> -> vector<8x128xf32>
    %c1_31 = arith.constant 1 : index
    %c0_32 = arith.constant 0 : index
    %c0_33 = arith.constant 0 : index
    %43 = vector.load %arg5[%c1_31, %c0_32, %c0_33] : memref<3x128x128xf32, #tpu.memory_space<vmem>>, vector<1x128x128xf32>
    %44 = vector.shape_cast %43 : vector<1x128x128xf32> to vector<128x128xf32>
    %cst_34 = arith.constant dense<0.000000e+00> : vector<8x128xf32>
    %45 = tpu.matmul %42, %44, %cst_34 {dimension_numbers = #tpu.dot_dimension_numbers<[1], [0], [0], [1], [0, 0, 1, 1], [], []>} : vector<8x128xf32>, vector<128x128xf32>, vector<8x128xf32> -> vector<8x128xf32>
    %46 = arith.addf %27, %45 : vector<8x128xf32>
    %cst_35 = arith.constant dense<0.000000e+00> : vector<128x128xf32>
    %47 = tpu.matmul %0, %41, %cst_35 {dimension_numbers = #tpu.dot_dimension_numbers<[1], [0], [0], [1], [0, 0, 1, 1], [], []>} : vector<128x128xbf16>, vector<128x128xbf16>, vector<128x128xf32> -> vector<128x128xf32>
    %48 = arith.truncf %47 : vector<128x128xf32> to vector<128x128xbf16>
    %c2 = arith.constant 2 : index
    %c0_36 = arith.constant 0 : index
    %c0_37 = arith.constant 0 : index
    %49 = vector.load %arg3[%c2, %c0_36, %c0_37] : memref<3x128x128xbf16, #tpu.memory_space<vmem>>, vector<1x128x128xbf16>
    %50 = vector.shape_cast %49 : vector<1x128x128xbf16> to vector<128x128xbf16>
    %cst_38 = arith.constant dense<0.000000e+00> : vector<128x128xf32>
    %51 = tpu.matmul %48, %50, %cst_38 {dimension_numbers = #tpu.dot_dimension_numbers<[1], [0], [0], [1], [0, 0, 1, 1], [], []>} : vector<128x128xbf16>, vector<128x128xbf16>, vector<128x128xf32> -> vector<128x128xf32>
    %c2_39 = arith.constant 2 : index
    %c0_40 = arith.constant 0 : index
    %c0_41 = arith.constant 0 : index
    %52 = vector.load %arg4[%c2_39, %c0_40, %c0_41] : memref<3x1x128xf32, #tpu.memory_space<vmem>>, vector<1x1x128xf32>
    %53 = vector.shape_cast %52 : vector<1x1x128xf32> to vector<1x128xf32>
    %54 = vector.broadcast %53 : vector<1x128xf32> to vector<128x128xf32>
    %55 = arith.addf %51, %54 : vector<128x128xf32>
    %cst_42 = arith.constant 0.000000e+00 : f32
    %56 = vector.broadcast %cst_42 : f32 to vector<128x128xf32>
    %57 = arith.maximumf %55, %56 : vector<128x128xf32>
    %cst_43 = arith.constant 0.000000e+00 : f32
    %58 = vector.broadcast %cst_43 : f32 to vector<128x128xf32>
    %59 = arith.select %4, %57, %58 : vector<128x128xi1>, vector<128x128xf32>
    %60 = arith.truncf %59 : vector<128x128xf32> to vector<128x128xbf16>
    %cst_44 = arith.constant dense<0.000000e+00> : vector<8x128xf32>
    %61 = tpu.matmul %1, %60, %cst_44 {dimension_numbers = #tpu.dot_dimension_numbers<[1], [0], [0], [1], [0, 0, 1, 1], [], []>} : vector<8x128xbf16>, vector<128x128xbf16>, vector<8x128xf32> -> vector<8x128xf32>
    %c2_45 = arith.constant 2 : index
    %c0_46 = arith.constant 0 : index
    %c0_47 = arith.constant 0 : index
    %62 = vector.load %arg5[%c2_45, %c0_46, %c0_47] : memref<3x128x128xf32, #tpu.memory_space<vmem>>, vector<1x128x128xf32>
    %63 = vector.shape_cast %62 : vector<1x128x128xf32> to vector<128x128xf32>
    %cst_48 = arith.constant dense<0.000000e+00> : vector<8x128xf32>
    %64 = tpu.matmul %61, %63, %cst_48 {dimension_numbers = #tpu.dot_dimension_numbers<[1], [0], [0], [1], [0, 0, 1, 1], [], []>} : vector<8x128xf32>, vector<128x128xf32>, vector<8x128xf32> -> vector<8x128xf32>
    %65 = arith.addf %46, %64 : vector<8x128xf32>
    %cst_49 = arith.constant 0.000000e+00 : f32
    %66 = vector.broadcast %cst_49 : f32 to vector<8x128xf32>
    %67 = arith.maximumf %65, %66 : vector<8x128xf32>
    %c0_50 = arith.constant 0 : index
    %c0_51 = arith.constant 0 : index
    %68 = vector.load %arg7[%c0_50, %c0_51] : memref<8x128xf32, #tpu.memory_space<vmem>>, vector<8x128xf32>
    tpu.vector_store %arg7[%c0_50, %c0_51], %67 {strides = array<i32>} : memref<8x128xf32, #tpu.memory_space<vmem>>, vector<8x128xf32>,
    return
  }
}

</mosaic_0001>

<bundles_post_ra>
// kernel: tpu_custom_call.1
= control target key start
LH: loop header
LB: loop body
LE: loop exit
PB: predicated region body
PF: predicated region fallthrough
CT: control target
= control target key end

     0   :  { %12 = vsyncpa [#allocation3], 0  ;;  %s1603_s0 = inlined_call_operand.hbm [shape: bf16[128,128], index: 0, kind: input, shape index: {}]   ;;  %s1604_s1 = inlined_call_operand.hbm [shape: bf16[128,128], index: 1, kind: input, shape index: {}]   ;;  %s1605_s2 = inlined_call_operand.hbm [shape: bf16[8,128], index: 2, kind: input, shape index: {}]   ;;  %s1606_s3 = inlined_call_operand.hbm [shape: bf16[3,128,128], index: 3, kind: input, shape index: {}]   ;;  %s1607_s4 = inlined_call_operand.vmem [shape: f32[3,1,128], index: 4, kind: input, shape index: {}]   ;;  %s1608_s5 = inlined_call_operand.hbm [shape: f32[3,128,128], index: 5, kind: input, shape index: {}]   ;;  %s1609_s6 = inlined_call_operand.vmem [shape: f32[1,128], index: 6, kind: input, shape index: {}]   ;;  %s1610_s7 = inlined_call_operand.hbm [shape: f32[8,128], index: 7, kind: output, shape index: {}]  }
   0x1   :  { %13 = vsyncpa [#allocation6], 0 }
   0x2   :  { %14 = vsyncpa [#allocation9], 0 }
   0x3   :  { %15 = vsyncpa [#allocation4], 0  ;;  %s33_s26 = sshll.u32 %s1604_s1, 4  ;;  %s1466_s27 = smov [#allocation5]   ;;  %s34_s26 = int_to_ptr.hbm [resolvable:$true] %s33_s26 }
   0x4   :  { %s35_s28 = sshll.u32 %s1466_s27, 4  ;;  %s57_s8 = sshll.u32 %s1606_s3, 4  ;;  %s36_s28 = int_to_ptr.vmem [resolvable:$true] %s35_s28  ;;  %s58_s8 = int_to_ptr.hbm [resolvable:$true] %s57_s8 }
   0x5   :  { %s1467_s9 = smov 64   ;;  %s1468_s10 = smov 4  }
   0x6   :  { %41 = dma.hbm_to_vmem [thread:$0]  %s34_s26, 1024, %s36_s28, [#allocation6], %s1467_s9, %s1467_s9, %s1468_s10  }
   0x7   :  { %s1469_s11 = smov [#allocation8]   ;;  %s20_s15 = sshll.u32 %s1603_s0, 4  ;;  %s21_s15 = int_to_ptr.hbm [resolvable:$true] %s20_s15 }
   0x8   :  { %s59_s12 = sshll.u32 %s1469_s11, 4  ;;  %s47_s17 = sshll.u32 %s1605_s2, 4  ;;  %s60_s12 = int_to_ptr.vmem [resolvable:$true] %s59_s12  ;;  %s48_s17 = int_to_ptr.hbm [resolvable:$true] %s47_s17 }
   0x9   :  { %65 = dma.hbm_to_vmem [thread:$0]  %s58_s8, 3072, %s60_s12, [#allocation9], %s1467_s9, %s1467_s9, %s1468_s10  }
   0xa   :  { %s1470_s18 = smov [#allocation2]   ;;  %s1471_s3 = smov [#allocation7]  }
   0xb   :  { %s22_s19 = sshll.u32 %s1470_s18, 4  ;;  %s49_s20 = sshll.u32 %s1471_s3, 4  ;;  %s23_s19 = int_to_ptr.vmem [resolvable:$true] %s22_s19  ;;  %s50_s20 = int_to_ptr.vmem [resolvable:$true] %s49_s20 }
   0xc   :  { %28 = dma.hbm_to_vmem [thread:$0]  %s21_s15, 1024, %s23_s19, [#allocation3], %s1467_s9, %s1467_s9, %s1468_s10  }
   0xd   :  { %s72_s23 = sshll.u32 %s1608_s5, 4  ;;  %s1472_s0 = smov [#allocation10]   ;;  %s73_s23 = int_to_ptr.hbm [resolvable:$true] %s72_s23 }
   0xe   :  { %52 = dma.hbm_to_vmem [thread:$0]  %s48_s17, 64, %s50_s20, [#allocation6]  }
   0xf   :  { %s74_s24 = sshll.u32 %s1472_s0, 4  ;;  %s1473_s25 = smov 128   ;;  %s75_s24 = int_to_ptr.vmem [resolvable:$true] %s74_s24 }
  0x10   :  { %s1474_s26 = smov 8  }
  0x11   :  { %80 = dma.hbm_to_vmem [thread:$0]  %s73_s23, 6144, %s75_s24, [#allocation9], %s1473_s25, %s1473_s25, %s1474_s26  }
  0x12   :  { %1458 = dma.done.wait [#allocation3], 1024  }
  0x13   :  { %1459 = vsyncadd [#allocation3], 4294966272 }
  0x14   :  { %1460 = dma.done.wait [#allocation6], 1088  }
  0x15   :  { %1461 = vsyncadd [#allocation6], 4294966208 }
  0x16   :  { %1462 = dma.done.wait [#allocation9], 9216  }
  0x17   :  { %1463 = vsyncadd [#allocation9], 4294958080  ;;  %v1265_v0 = vld [vmem:[#allocation2 + $0x38] sm:$0xff]  ;;  %v1264_v1 = vld [vmem:[#allocation2 + $0x30] sm:$0xff]  ;;  %s1475_s9 = smov [#allocation11]   ;;  %s1076_s13 = sshll.u32 %s1610_s7, 4  ;;  %s1077_s13 = int_to_ptr.hbm [resolvable:$true] %s1076_s13 }
  0x18   :  { %269 = vmatpush.bf16.msra.mxu0 %v1265_v0  ;;  %v1263_v2 = vld [vmem:[#allocation2 + $0x28] sm:$0xff]  ;;  %v1262_v3 = vld [vmem:[#allocation2 + $0x20] sm:$0xff]  ;;  %v1261_v4 = vld [vmem:[#allocation2 + $0x18] sm:$0xff]  ;;  %s1074_s10 = sshll.u32 %s1475_s9, 4  ;;  %s1075_s10 = int_to_ptr.vmem [resolvable:$true] %s1074_s10 }
  0x19   :  { %v1273_v5 = vld [vmem:[#allocation8 + $0x38] sm:$0xff]  ;;  %v1260_v6 = vld [vmem:[#allocation2 + $0x10] sm:$0xff]  ;;  %v1259_v8 = vld [vmem:[#allocation2 + $0x8] sm:$0xff] }
  0x1a   :  { %394 = vmatpush.bf16.msra.mxu1 %v1273_v5  ;;  %v1272_v7 = vld [vmem:[#allocation8 + $0x30] sm:$0xff]  ;;  %1290 = vmatpush.bf16.msra.mxu3 %v1273_v5  ;;  %v1271_v9 = vld [vmem:[#allocation8 + $0x28] sm:$0xff]  ;;  %v1258_v10 = vld [vmem:[#allocation2] sm:$0xff] }
  0x1b   :  { %v1270_v11 = vld [vmem:[#allocation8 + $0x20] sm:$0xff]  ;;  %v1269_v13 = vld [vmem:[#allocation8 + $0x18] sm:$0xff]  ;;  %v1268_v15 = vld [vmem:[#allocation8 + $0x10] sm:$0xff] }
  0x1c   :  { %270 = vmatpush.bf16.msra.mxu0 %v1264_v1  ;;  %v1531_v12 = vld [vmem:[#allocation5] sm:$0xff]  ;;  %v1534_v14 = vld [vmem:[#allocation5 + $0x8] sm:$0xff]  ;;  %v1537_v18 = vld [vmem:[#allocation5 + $0x10] sm:$0xff] }
  0x1d   :  { %v1267_v16 = vld [vmem:[#allocation8 + $0x8] sm:$0xff]  ;;  %v1266_v17 = vld [vmem:[#allocation8] sm:$0xff]  ;;  %v1540_v22 = vld [vmem:[#allocation5 + $0x18] sm:$0xff] }
  0x1e   :  { %395 = vmatpush.bf16.msra.mxu1 %v1272_v7  ;;  %1291 = vmatpush.bf16.msra.mxu3 %v1272_v7  ;;  %v1543_v26 = vld [vmem:[#allocation5 + $0x20] sm:$0xff]  ;;  %v1546_v27 = vld [vmem:[#allocation5 + $0x28] sm:$0xff]  ;;  %v1549_v28 = vld [vmem:[#allocation5 + $0x30] sm:$0xff] }
  0x1f   :  { %v1552_v29 = vld [vmem:[#allocation5 + $0x38] sm:$0xff]  ;;  %v1310_v34 = vld [vmem:[%s1607_s4] ss:$0 sm:$0xff]  ;;  %v509_v54 = vld [vmem:[#allocation10 + $0x68] sm:$0xff] }
  0x20   :  { %271 = vmatpush.bf16.msra.mxu0 %v1263_v2  ;;  %v511_v48 = vld [vmem:[#allocation10 + $0x78] sm:$0xff]  ;;  %v510_v49 = vld [vmem:[#allocation10 + $0x70] sm:$0xff]  ;;  %v508_v55 = vld [vmem:[#allocation10 + $0x60] sm:$0xff] }
  0x21   :  { %v1558_v51 = vld [vmem:[#allocation7] sm:$0xf]  ;;  %v506_v57 = vld [vmem:[#allocation10 + $0x50] sm:$0xff]  ;;  %v505_v59 = vld [vmem:[#allocation10 + $0x48] sm:$0xff] }
  0x22   :  { %396 = vmatpush.bf16.msra.mxu1 %v1271_v9  ;;  %1292 = vmatpush.bf16.msra.mxu3 %v1271_v9  ;;  %v507_v56 = vld [vmem:[#allocation10 + $0x58] sm:$0xff]  ;;  %v504_v60 = vld [vmem:[#allocation10 + $0x40] sm:$0xff]  ;;  %v502_v62 = vld [vmem:[#allocation10 + $0x30] sm:$0xff] }
  0x23   :  { %v503_v61 = vld [vmem:[#allocation10 + $0x38] sm:$0xff]  ;;  %v501_v1 = vld [vmem:[#allocation10 + $0x28] sm:$0xff]  ;;  %v500_v2 = vld [vmem:[#allocation10 + $0x20] sm:$0xff] }
  0x24   :  { %272 = vmatpush.bf16.msra.mxu0 %v1262_v3  ;;  %v499_v3 = vld [vmem:[#allocation10 + $0x18] sm:$0xff]  ;;  %v496_v7 = vld [vmem:[#allocation10] sm:$0xff] }
  0x26   :  { %397 = vmatpush.bf16.msra.mxu1 %v1270_v11  ;;  %1293 = vmatpush.bf16.msra.mxu3 %v1270_v11 }
  0x28   :  { %273 = vmatpush.bf16.msra.mxu0 %v1261_v4  ;;  %v498_v4 = vld [vmem:[#allocation10 + $0x10] sm:$0xff] }
  0x2a   :  { %398 = vmatpush.bf16.msra.mxu1 %v1269_v13  ;;  %1294 = vmatpush.bf16.msra.mxu3 %v1269_v13  ;;  %v1281_v13 = vld [vmem:[#allocation8 + $0x78] sm:$0xff] }
  0x2c   :  { %274 = vmatpush.bf16.msra.mxu0 %v1260_v6  ;;  %v497_v6 = vld [vmem:[#allocation10 + $0x8] sm:$0xff] }
  0x2e   :  { %399 = vmatpush.bf16.msra.mxu1 %v1268_v15  ;;  %1295 = vmatpush.bf16.msra.mxu3 %v1268_v15 }
  0x30   :  { %275 = vmatpush.bf16.msra.mxu0 %v1259_v8 }
  0x32   :  { %400 = vmatpush.bf16.msra.mxu1 %v1267_v16  ;;  %1296 = vmatpush.bf16.msra.mxu3 %v1267_v16  ;;  %v1280_v16 = vld [vmem:[#allocation8 + $0x70] sm:$0xff] }
  0x34   :  { %276 = vmatpush.bf16.msra.mxu0 %v1258_v10 }
  0x36   :  { %401 = vmatpush.bf16.msra.mxu1 %v1266_v17  ;;  %1297 = vmatpush.bf16.msra.mxu3 %v1266_v17 }
  0x37   :  { %277 = vmatmul.bf16.vlgmr.msra.gmra.mxu0 %v1531_v12 }
  0x3a   :  { %512 = vmatpush.msrb.mxu3 %v511_v48 }
  0x3c   :  { %513 = vmatpush.msrb.mxu3 %v510_v49 }
  0x3e   :  { %514 = vmatpush.msrb.mxu3 %v509_v54 }
  0x40   :  { %515 = vmatpush.msrb.mxu3 %v508_v55 }
  0x42   :  { %516 = vmatpush.msrb.mxu3 %v507_v56 }
  0x44   :  { %517 = vmatpush.msrb.mxu3 %v506_v57  ;;  %v1312_v57 = vld [vmem:[%s1607_s4 + $0x1] ss:$0 sm:$0xff] }
  0x46   :  { %518 = vmatpush.msrb.mxu3 %v505_v59  ;;  %v778_v59 = vld [vmem:[#allocation10 + $0xf8] sm:$0xff] }
  0x47   :  { %282 = vmatmul.bf16.gmra.mxu0 %v1534_v14 }
  0x48   :  { %519 = vmatpush.msrb.mxu3 %v504_v60  ;;  %v777_v60 = vld [vmem:[#allocation10 + $0xf0] sm:$0xff] }
  0x4a   :  { %520 = vmatpush.msrb.mxu3 %v503_v61 }
  0x4c   :  { %521 = vmatpush.msrb.mxu3 %v502_v62 }
  0x4e   :  { %522 = vmatpush.msrb.mxu3 %v501_v1 }
  0x50   :  { %523 = vmatpush.msrb.mxu3 %v500_v2 }
  0x52   :  { %524 = vmatpush.msrb.mxu3 %v499_v3 }
  0x54   :  { %525 = vmatpush.msrb.mxu3 %v498_v4 }
  0x56   :  { %526 = vmatpush.msrb.mxu3 %v497_v6 }
  0x57   :  { %287 = vmatmul.bf16.gmra.mxu0 %v1537_v18 }
  0x58   :  { %527 = vmatpush.msrb.mxu3 %v496_v7 }
  0x67   :  { %292 = vmatmul.bf16.gmra.mxu0 %v1540_v22 }
  0x77   :  { %297 = vmatmul.bf16.gmra.mxu0 %v1543_v26 }
  0x87   :  { %302 = vmatmul.bf16.gmra.mxu0 %v1546_v27 }
  0x97   :  { %307 = vmatmul.bf16.gmra.mxu0 %v1549_v28 }
  0xa7   :  { %312 = vmatmul.bf16.gmra.mxu0 %v1552_v29 }
  0xb4   :  { %v278_v19 = vpop.f32.mrf.mxu0 }
  0xbc   :  { %v280_v20 = vpop.f32.mrf.mxu0 }
  0xbd   :  { %v318_v21 = vpack.c.bf16 %v280_v20, %v278_v19  ;;  %v1279_v19 = vld [vmem:[#allocation8 + $0x68] sm:$0xff]  ;;  %v1278_v20 = vld [vmem:[#allocation8 + $0x60] sm:$0xff] }
  0xbf   :  { %402 = vmatmul.bf16.vlgmr.msra.gmra.mxu1 %v318_v21 }
  0xc4   :  { %v283_v23 = vpop.f32.mrf.mxu0 }
  0xcc   :  { %v285_v24 = vpop.f32.mrf.mxu0 }
  0xcd   :  { %v319_v25 = vpack.c.bf16 %v285_v24, %v283_v23  ;;  %v1277_v23 = vld [vmem:[#allocation8 + $0x58] sm:$0xff] }
  0xcf   :  { %407 = vmatmul.bf16.gmra.mxu1 %v319_v25  ;;  %v1276_v25 = vld [vmem:[#allocation8 + $0x50] sm:$0xff] }
  0xd4   :  { %v288_v32 = vpop.f32.mrf.mxu0 }
  0xdc   :  { %v290_v36 = vpop.f32.mrf.mxu0 }
  0xdd   :  { %v320_v38 = vpack.c.bf16 %v290_v36, %v288_v32 }
  0xdf   :  { %412 = vmatmul.bf16.gmra.mxu1 %v320_v38 }
  0xe4   :  { %v293_v47 = vpop.f32.mrf.mxu0 }
  0xec   :  { %v295_v52 = vpop.f32.mrf.mxu0 }
  0xed   :  { %v321_v53 = vpack.c.bf16 %v295_v52, %v293_v47 }
  0xef   :  { %417 = vmatmul.bf16.gmra.mxu1 %v321_v53 }
  0xf4   :  { %v298_v58 = vpop.f32.mrf.mxu0 }
  0xfc   :  { %v300_v63 = vpop.f32.mrf.mxu0 }
  0xfd   :  { %v322_v0 = vpack.c.bf16 %v300_v63, %v298_v58  ;;  %v776_v63 = vld [vmem:[#allocation10 + $0xe8] sm:$0xff] }
  0xff   :  { %422 = vmatmul.bf16.gmra.mxu1 %v322_v0 }
 0x104   :  { %v303_v5 = vpop.f32.mrf.mxu0 }
 0x10c   :  { %v305_v8 = vpop.f32.mrf.mxu0 }
 0x10d   :  { %v323_v9 = vpack.c.bf16 %v305_v8, %v303_v5 }
 0x10f   :  { %427 = vmatmul.bf16.gmra.mxu1 %v323_v9  ;;  %v775_v9 = vld [vmem:[#allocation10 + $0xe0] sm:$0xff] }
 0x114   :  { %v308_v10 = vpop.f32.mrf.mxu0 }
 0x11c   :  { %v310_v11 = vpop.f32.mrf.mxu0 }
 0x11d   :  { %v324_v15 = vpack.c.bf16 %v310_v11, %v308_v10  ;;  %v774_v10 = vld [vmem:[#allocation10 + $0xd8] sm:$0xff] }
 0x11e   :  { %v1289_v11 = vld [vmem:[#allocation8 + $0xb8] sm:$0xff] }
 0x11f   :  { %432 = vmatmul.bf16.vlgmr.msra.gmra.mxu3 %v324_v15  ;;  %v773_v15 = vld [vmem:[#allocation10 + $0xd0] sm:$0xff] }
 0x120   :  { %660 = vmatpush.bf16.msra.mxu3 %v1281_v13 }
 0x124   :  { %v313_v17 = vpop.f32.mrf.mxu0  ;;  %661 = vmatpush.bf16.msra.mxu3 %v1280_v16  ;;  %v1288_v16 = vld [vmem:[#allocation8 + $0xb0] sm:$0xff] }
 0x128   :  { %662 = vmatpush.bf16.msra.mxu3 %v1279_v19 }
 0x12c   :  { %v315_v21 = vpop.f32.mrf.mxu0  ;;  %663 = vmatpush.bf16.msra.mxu3 %v1278_v20  ;;  %v771_v20 = vld [vmem:[#allocation10 + $0xc0] sm:$0xff] }
 0x12d   :  { %v325_v24 = vpack.c.bf16 %v315_v21, %v313_v17  ;;  %v772_v17 = vld [vmem:[#allocation10 + $0xc8] sm:$0xff] }
 0x12e   :  { %v1287_v21 = vld [vmem:[#allocation8 + $0xa8] sm:$0xff] }
 0x12f   :  { %437 = vmatmul.bf16.gmra.mxu3 %v325_v24  ;;  %v769_v24 = vld [vmem:[#allocation10 + $0xb0] sm:$0xff] }
 0x130   :  { %664 = vmatpush.bf16.msra.mxu3 %v1277_v23  ;;  %v770_v23 = vld [vmem:[#allocation10 + $0xb8] sm:$0xff] }
 0x134   :  { %665 = vmatpush.bf16.msra.mxu3 %v1276_v25  ;;  %v1286_v25 = vld [vmem:[#allocation8 + $0xa0] sm:$0xff] }
 0x13c   :  { %v403_v30 = vpop.f32.mrf.mxu1 }
 0x13d   :  { %v404_v41 = vadd.f32 %v1310_v34, %v403_v30  ;;  %v1275_v30 = vld [vmem:[#allocation8 + $0x48] sm:$0xff] }
 0x13e   :  { %666 = vmatpush.bf16.msra.mxu3 %v1275_v30  ;;  %v768_v30 = vld [vmem:[#allocation10 + $0xa8] sm:$0xff] }
 0x13f   :  { %v443_v46 = vmax.f32 %v404_v41, 0.0 }
 0x144   :  { %v405_v31 = vpop.f32.mrf.mxu1 }
 0x145   :  { %v406_v39 = vadd.f32 %v1310_v34, %v405_v31  ;;  %v1274_v31 = vld [vmem:[#allocation8 + $0x40] sm:$0xff] }
 0x146   :  { %667 = vmatpush.bf16.msra.mxu3 %v1274_v31 }
 0x147   :  { %v444_v44 = vmax.f32 %v406_v39, 0.0 }
 0x149   :  { %v475_v50 = vpack.c.bf16 %v444_v44, %v443_v46 }
 0x14c   :  { %v408_v33 = vpop.f32.mrf.mxu1 }
 0x14d   :  { %v409_v35 = vadd.f32 %v1310_v34, %v408_v33 }
 0x14f   :  { %v445_v42 = vmax.f32 %v409_v35, 0.0 }
 0x154   :  { %v410_v37 = vpop.f32.mrf.mxu1 }
 0x155   :  { %v411_v40 = vadd.f32 %v1310_v34, %v410_v37 }
 0x157   :  { %v446_v43 = vmax.f32 %v411_v40, 0.0 }
 0x159   :  { %v476_v45 = vpack.c.bf16 %v446_v43, %v445_v42 }
 0x15b   :  { %489 = vmatpush.bf16.msra.mxu2 %v476_v45  ;;  %539 = vmatpush.bf16.msrb.mxu0 %v476_v45 }
 0x15c   :  { %v413_v32 = vpop.f32.mrf.mxu1 }
 0x15f   :  { %490 = vmatpush.bf16.msra.mxu2 %v475_v50  ;;  %540 = vmatpush.bf16.msrb.mxu0 %v475_v50 }
 0x162   :  { %491 = vmatmul.bf16.vlgmr.msra.gmra.mxu2 %v1558_v51  ;;  %541 = vmatmul.bf16.vlgmr.msrb.gmra.mxu0 %v1531_v12 }
 0x163   :  { %1298 = vmatpush.bf16.msrb.mxu2 %v476_v45  ;;  %779 = vmatpush.msra.mxu0 %v778_v59 }
 0x164   :  { %v415_v33 = vpop.f32.mrf.mxu1 }
 0x165   :  { %780 = vmatpush.msra.mxu0 %v777_v60  ;;  %v767_v33 = vld [vmem:[#allocation10 + $0xa0] sm:$0xff] }
 0x167   :  { %1299 = vmatpush.bf16.msrb.mxu2 %v475_v50  ;;  %781 = vmatpush.msra.mxu0 %v776_v63  ;;  %v1044_v63 = vld [vmem:[#allocation10 + $0x170] sm:$0xff] }
 0x169   :  { %782 = vmatpush.msra.mxu0 %v775_v9  ;;  %v1037_v9 = vld [vmem:[#allocation10 + $0x138] sm:$0xff] }
 0x16b   :  { %783 = vmatpush.msra.mxu0 %v774_v10  ;;  %v1313_v10 = vld [vmem:[%s1607_s4 + $0x2] ss:$0 sm:$0xff] }
 0x16c   :  { %v418_v35 = vpop.f32.mrf.mxu1 }
 0x16d   :  { %784 = vmatpush.msra.mxu0 %v773_v15 }
 0x16f   :  { %785 = vmatpush.msra.mxu0 %v772_v17 }
 0x171   :  { %786 = vmatpush.msra.mxu0 %v771_v20 }
 0x172   :  { %546 = vmatmul.bf16.gmra.mxu0 %v1534_v14  ;;  %561 = vmatmul.bf16.vlgmr.msrb.gmra.mxu2 %v1543_v26 }
 0x173   :  { %787 = vmatpush.msra.mxu0 %v770_v23  ;;  %v1034_v23 = vld [vmem:[#allocation10 + $0x120] sm:$0xff] }
 0x174   :  { %v420_v38 = vpop.f32.mrf.mxu1 }
 0x175   :  { %788 = vmatpush.msra.mxu0 %v769_v24  ;;  %v1284_v38 = vld [vmem:[#allocation8 + $0x90] sm:$0xff] }
 0x177   :  { %789 = vmatpush.msra.mxu0 %v768_v30 }
 0x179   :  { %790 = vmatpush.msra.mxu0 %v767_v33 }
 0x17c   :  { %v423_v42 = vpop.f32.mrf.mxu1 }
 0x17d   :  { %v1282_v42 = vld [vmem:[#allocation8 + $0x80] sm:$0xff] }
 0x182   :  { %566 = vmatmul.bf16.gmra.mxu2 %v1546_v27  ;;  %551 = vmatmul.bf16.gmra.mxu0 %v1537_v18 }
 0x184   :  { %v425_v44 = vpop.f32.mrf.mxu1 }
 0x18c   :  { %v428_v46 = vpop.f32.mrf.mxu1 }
 0x192   :  { %571 = vmatmul.bf16.gmra.mxu2 %v1549_v28  ;;  %556 = vmatmul.bf16.gmra.mxu0 %v1540_v22 }
 0x194   :  { %v430_v47 = vpop.f32.mrf.mxu1 }
 0x1a2   :  { %576 = vmatmul.bf16.gmra.mxu2 %v1552_v29  ;;  %v433_v48 = vpop.f32.mrf.mxu3 }
 0x1aa   :  { %v435_v49 = vpop.f32.mrf.mxu3 }
 0x1b2   :  { %v438_v50 = vpop.f32.mrf.mxu3 }
 0x1ba   :  { %v440_v52 = vpop.f32.mrf.mxu3 }
 0x1df   :  { %v542_v34 = vpop.f32.mrf.mxu0 }
 0x1e5   :  { %v492_v36 = vpop.f32.mrf.mxu2 }
 0x1e6   :  { %528 = vmatmul.f32.vlgmr.msrb.gmra.mxu3 %v492_v36 }
 0x1e7   :  { %v544_v37 = vpop.f32.mrf.mxu0 }
 0x1e8   :  { %v582_v39 = vpack.c.bf16 %v544_v37, %v542_v34  ;;  %v766_v34 = vld [vmem:[#allocation10 + $0x98] sm:$0xff] }
 0x1e9   :  { %791 = vmatpush.msra.mxu0 %v766_v34 }
 0x1ed   :  { %v494_v40 = vpop.f32.mrf.mxu2 }
 0x1ee   :  { %668 = vmatmul.bf16.vlgmr.msra.gmra.mxu3 %v582_v39  ;;  %v765_v39 = vld [vmem:[#allocation10 + $0x90] sm:$0xff]  ;;  %v764_v40 = vld [vmem:[#allocation10 + $0x88] sm:$0xff] }
 0x1ef   :  { %v547_v41 = vpop.f32.mrf.mxu0  ;;  %792 = vmatpush.msra.mxu0 %v765_v39 }
 0x1f1   :  { %793 = vmatpush.msra.mxu0 %v764_v40 }
 0x1f5   :  { %v1574_v58 = vpop.f32.mrf.mxu2 }
 0x1f7   :  { %v549_v43 = vpop.f32.mrf.mxu0 }
 0x1f8   :  { %v583_v45 = vpack.c.bf16 %v549_v43, %v547_v41  ;;  %v1283_v41 = vld [vmem:[#allocation8 + $0x88] sm:$0xff] }
 0x1fd   :  { %v1576_v7 = vpop.f32.mrf.mxu2 }
 0x1fe   :  { %673 = vmatmul.bf16.gmra.mxu3 %v583_v45 }
 0x205   :  { %v1580_v19 = vpop.f32.mrf.mxu2 }
 0x20d   :  { %v569_v31 = vpop.f32.mrf.mxu2 }
 0x20e   :  { %v587_v32 = vpack.c.bf16 %v569_v31, %v1580_v19  ;;  %v1035_v19 = vld [vmem:[#allocation10 + $0x128] sm:$0xff]  ;;  %v1033_v31 = vld [vmem:[#allocation10 + $0x118] sm:$0xff] }
 0x215   :  { %v572_v35 = vpop.f32.mrf.mxu2 }
 0x21d   :  { %v574_v36 = vpop.f32.mrf.mxu2 }
 0x21e   :  { %v588_v37 = vpack.c.bf16 %v574_v36, %v572_v35 }
 0x269   :  { %v1569_v53 = vpop.f32.mrf.mxu3 }
 0x271   :  { %v669_v54 = vpop.f32.mrf.mxu3 }
 0x272   :  { %v670_v2 = vadd.f32 %v1312_v57, %v669_v54  ;;  %v586_v54 = vpack.c.bf16 %v1576_v7, %v1574_v58  ;;  %v1042_v58 = vld [vmem:[#allocation10 + $0x160] sm:$0xff]  ;;  %v1039_v7 = vld [vmem:[#allocation10 + $0x148] sm:$0xff] }
 0x274   :  { %v709_v8 = vmax.f32 %v670_v2, 0.0  ;;  %v1043_v2 = vld [vmem:[#allocation10 + $0x168] sm:$0xff] }
 0x279   :  { %v671_v55 = vpop.f32.mrf.mxu3 }
 0x27a   :  { %v672_v0 = vadd.f32 %v1312_v57, %v671_v55 }
 0x27c   :  { %v710_v5 = vmax.f32 %v672_v0, 0.0 }
 0x27e   :  { %v741_v13 = vpack.c.bf16 %v710_v5, %v709_v8  ;;  %v1038_v8 = vld [vmem:[#allocation10 + $0x140] sm:$0xff] }
 0x281   :  { %v674_v56 = vpop.f32.mrf.mxu3 }
 0x282   :  { %v675_v61 = vadd.f32 %v1312_v57, %v674_v56 }
 0x284   :  { %v711_v3 = vmax.f32 %v675_v61, 0.0 }
 0x289   :  { %v676_v62 = vpop.f32.mrf.mxu3 }
 0x28a   :  { %v677_v1 = vadd.f32 %v1312_v57, %v676_v62  ;;  %v1045_v62 = vld [vmem:[#allocation10 + $0x178] sm:$0xff] }
 0x28b   :  { %1046 = vmatpush.msrb.mxu3 %v1045_v62 }
 0x28c   :  { %v712_v4 = vmax.f32 %v677_v1, 0.0 }
 0x28d   :  { %1047 = vmatpush.msrb.mxu3 %v1044_v63 }
 0x28e   :  { %v742_v6 = vpack.c.bf16 %v712_v4, %v711_v3  ;;  %v1041_v3 = vld [vmem:[#allocation10 + $0x158] sm:$0xff]  ;;  %v1040_v4 = vld [vmem:[#allocation10 + $0x150] sm:$0xff] }
 0x28f   :  { %1048 = vmatpush.msrb.mxu3 %v1043_v2 }
 0x290   :  { %755 = vmatpush.bf16.msra.mxu2 %v742_v6  ;;  %806 = vmatpush.bf16.msrb.mxu1 %v742_v6 }
 0x291   :  { %1049 = vmatpush.msrb.mxu3 %v1042_v58 }
 0x293   :  { %1050 = vmatpush.msrb.mxu3 %v1041_v3 }
 0x294   :  { %756 = vmatpush.bf16.msra.mxu2 %v741_v13  ;;  %807 = vmatpush.bf16.msrb.mxu1 %v741_v13 }
 0x295   :  { %1051 = vmatpush.msrb.mxu3 %v1040_v4 }
 0x297   :  { %757 = vmatmul.bf16.vlgmr.msra.gmra.mxu2 %v1558_v51  ;;  %808 = vmatmul.bf16.vlgmr.msrb.gmra.mxu1 %v1531_v12  ;;  %v1285_v12 = vld [vmem:[#allocation8 + $0x98] sm:$0xff] }
 0x298   :  { %927 = vmatpush.bf16.msrb.mxu2 %v1289_v11  ;;  %1052 = vmatpush.msrb.mxu3 %v1039_v7  ;;  %v1036_v11 = vld [vmem:[#allocation10 + $0x130] sm:$0xff] }
 0x29a   :  { %1053 = vmatpush.msrb.mxu3 %v1038_v8 }
 0x29c   :  { %928 = vmatpush.bf16.msrb.mxu2 %v1288_v16  ;;  %1054 = vmatpush.msrb.mxu3 %v1037_v9 }
 0x29e   :  { %1055 = vmatpush.msrb.mxu3 %v1036_v11 }
 0x2a0   :  { %929 = vmatpush.bf16.msrb.mxu2 %v1287_v21  ;;  %1056 = vmatpush.msrb.mxu3 %v1035_v19 }
 0x2a2   :  { %1057 = vmatpush.msrb.mxu3 %v1034_v23 }
 0x2a4   :  { %930 = vmatpush.bf16.msrb.mxu2 %v1286_v25  ;;  %1058 = vmatpush.msrb.mxu3 %v1033_v31 }
 0x2a7   :  { %813 = vmatmul.bf16.gmra.mxu1 %v1534_v14  ;;  %v763_v14 = vld [vmem:[#allocation10 + $0x80] sm:$0xff] }
 0x2a8   :  { %931 = vmatpush.bf16.msrb.mxu2 %v1285_v12  ;;  %794 = vmatpush.msra.mxu0 %v763_v14  ;;  %v1032_v12 = vld [vmem:[#allocation10 + $0x110] sm:$0xff] }
 0x2a9   :  { %1059 = vmatpush.msrb.mxu3 %v1032_v12 }
 0x2ac   :  { %932 = vmatpush.bf16.msrb.mxu2 %v1284_v38 }
 0x2b0   :  { %933 = vmatpush.bf16.msrb.mxu2 %v1283_v41 }
 0x2b4   :  { %934 = vmatpush.bf16.msrb.mxu2 %v1282_v42 }
 0x2b7   :  { %818 = vmatmul.bf16.gmra.mxu1 %v1537_v18  ;;  %v552_v18 = vpop.f32.mrf.mxu0 }
 0x2c7   :  { %823 = vmatmul.bf16.gmra.mxu1 %v1540_v22  ;;  %v577_v22 = vpop.f32.mrf.mxu2 }
 0x2cf   :  { %v579_v43 = vpop.f32.mrf.mxu2 }
 0x2d0   :  { %v589_v56 = vpack.c.bf16 %v579_v43, %v577_v22 }
 0x2d7   :  { %828 = vmatmul.bf16.gmra.mxu1 %v1543_v26  ;;  %v554_v26 = vpop.f32.mrf.mxu0 }
 0x2df   :  { %v557_v44 = vpop.f32.mrf.mxu0 }
 0x2e7   :  { %833 = vmatmul.bf16.gmra.mxu1 %v1546_v27  ;;  %v584_v27 = vpack.c.bf16 %v554_v26, %v552_v18  ;;  %v559_v47 = vpop.f32.mrf.mxu0 }
 0x2e8   :  { %v585_v48 = vpack.c.bf16 %v559_v47, %v557_v44 }
 0x2e9   :  { %678 = vmatmul.bf16.gmra.mxu3 %v584_v27 }
 0x2f7   :  { %838 = vmatmul.bf16.gmra.mxu1 %v1549_v28 }
 0x2f9   :  { %683 = vmatmul.bf16.gmra.mxu3 %v585_v48 }
 0x307   :  { %843 = vmatmul.bf16.gmra.mxu1 %v1552_v29 }
 0x309   :  { %688 = vmatmul.bf16.gmra.mxu3 %v586_v54 }
 0x314   :  { %v809_v45 = vpop.f32.mrf.mxu1 }
 0x319   :  { %693 = vmatmul.bf16.gmra.mxu3 %v587_v32 }
 0x31a   :  { %v758_v46 = vpop.f32.mrf.mxu2 }
 0x31b   :  { %795 = vmatmul.f32.vlgmr.msra.gmra.mxu0 %v758_v46 }
 0x31c   :  { %v811_v28 = vpop.f32.mrf.mxu1 }
 0x31d   :  { %v849_v49 = vpack.c.bf16 %v811_v28, %v809_v45 }
 0x31f   :  { %935 = vmatmul.bf16.vlgmr.msrb.gmra.mxu2 %v849_v49 }
 0x322   :  { %v760_v50 = vpop.f32.mrf.mxu2 }
 0x324   :  { %v814_v52 = vpop.f32.mrf.mxu1 }
 0x329   :  { %698 = vmatmul.bf16.gmra.mxu3 %v588_v37  ;;  %v1031_v37 = vld [vmem:[#allocation10 + $0x108] sm:$0xff] }
 0x32a   :  { %1060 = vmatpush.msrb.mxu3 %v1031_v37 }
 0x32c   :  { %v816_v29 = vpop.f32.mrf.mxu1 }
 0x32d   :  { %v850_v55 = vpack.c.bf16 %v816_v29, %v814_v52  ;;  %v1030_v29 = vld [vmem:[#allocation10 + $0x100] sm:$0xff] }
 0x32e   :  { %1061 = vmatpush.msrb.mxu3 %v1030_v29 }
 0x32f   :  { %940 = vmatmul.bf16.gmra.mxu2 %v850_v55 }
 0x334   :  { %v819_v16 = vpop.f32.mrf.mxu1 }
 0x339   :  { %703 = vmatmul.bf16.gmra.mxu3 %v589_v56 }
 0x33c   :  { %v821_v36 = vpop.f32.mrf.mxu1 }
 0x33d   :  { %v851_v38 = vpack.c.bf16 %v821_v36, %v819_v16 }
 0x33f   :  { %945 = vmatmul.bf16.gmra.mxu2 %v851_v38 }
 0x344   :  { %v824_v41 = vpop.f32.mrf.mxu1 }
 0x34c   :  { %v826_v42 = vpop.f32.mrf.mxu1 }
 0x34d   :  { %v852_v18 = vpack.c.bf16 %v826_v42, %v824_v41 }
 0x34f   :  { %950 = vmatmul.bf16.gmra.mxu2 %v852_v18 }
 0x354   :  { %v829_v26 = vpop.f32.mrf.mxu1 }
 0x35c   :  { %v831_v43 = vpop.f32.mrf.mxu1 }
 0x35d   :  { %v853_v44 = vpack.c.bf16 %v831_v43, %v829_v26 }
 0x35f   :  { %955 = vmatmul.bf16.gmra.mxu2 %v853_v44 }
 0x364   :  { %v834_v46 = vpop.f32.mrf.mxu1 }
 0x36c   :  { %v679_v57 = vpop.f32.mrf.mxu3  ;;  %v836_v47 = vpop.f32.mrf.mxu1 }
 0x36d   :  { %v854_v48 = vpack.c.bf16 %v836_v47, %v834_v46 }
 0x36f   :  { %960 = vmatmul.bf16.gmra.mxu2 %v854_v48 }
 0x374   :  { %v681_v59 = vpop.f32.mrf.mxu3  ;;  %v839_v28 = vpop.f32.mrf.mxu1 }
 0x37c   :  { %v684_v60 = vpop.f32.mrf.mxu3  ;;  %v841_v49 = vpop.f32.mrf.mxu1 }
 0x384   :  { %v686_v0 = vpop.f32.mrf.mxu3  ;;  %v844_v50 = vpop.f32.mrf.mxu1 }
 0x38c   :  { %v689_v5 = vpop.f32.mrf.mxu3  ;;  %v846_v52 = vpop.f32.mrf.mxu1 }
 0x38d   :  { %v856_v54 = vpack.c.bf16 %v846_v52, %v844_v50 }
 0x394   :  { %v691_v13 = vpop.f32.mrf.mxu3 }
 0x398   :  { %v796_v55 = vpop.f32.mrf.mxu0 }
 0x39c   :  { %v694_v34 = vpop.f32.mrf.mxu3 }
 0x3a2   :  { %v936_v61 = vpop.f32.mrf.mxu2 }
 0x3a3   :  { %v937_v24 = vadd.f32 %v1313_v10, %v936_v61 }
 0x3a4   :  { %v696_v40 = vpop.f32.mrf.mxu3 }
 0x3a5   :  { %v976_v35 = vmax.f32 %v937_v24, 0.0 }
 0x3aa   :  { %v938_v1 = vpop.f32.mrf.mxu2 }
 0x3ab   :  { %v939_v20 = vadd.f32 %v1313_v10, %v938_v1 }
 0x3ac   :  { %v699_v14 = vpop.f32.mrf.mxu3 }
 0x3ad   :  { %v977_v32 = vmax.f32 %v939_v20, 0.0 }
 0x3af   :  { %v1008_v39 = vpack.c.bf16 %v977_v32, %v976_v35 }
 0x3b2   :  { %v941_v6 = vpop.f32.mrf.mxu2 }
 0x3b3   :  { %v942_v15 = vadd.f32 %v1313_v10, %v941_v6  ;;  %v1311_v6 = vld [vmem:[%s1609_s6] ss:$0 sm:$0xff] }
 0x3b4   :  { %v701_v22 = vpop.f32.mrf.mxu3  ;;  %v532_v7 = vadd.f32 %v1311_v6, %v1569_v53 }
 0x3b5   :  { %v978_v25 = vmax.f32 %v942_v15, 0.0 }
 0x3b6   :  { %v799_v8 = vadd.f32 %v796_v55, %v532_v7 }
 0x3ba   :  { %v943_v17 = vpop.f32.mrf.mxu2 }
 0x3bb   :  { %v944_v21 = vadd.f32 %v1313_v10, %v943_v17 }
 0x3bc   :  { %v704_v27 = vpop.f32.mrf.mxu3 }
 0x3bd   :  { %v979_v30 = vmax.f32 %v944_v21, 0.0 }
 0x3bf   :  { %v1009_v33 = vpack.c.bf16 %v979_v30, %v978_v25 }
 0x3c1   :  { %1022 = vmatpush.bf16.msrb.mxu0 %v1009_v33 }
 0x3c2   :  { %v946_v57 = vpop.f32.mrf.mxu2 }
 0x3c4   :  { %v706_v45 = vpop.f32.mrf.mxu3 }
 0x3c5   :  { %1023 = vmatpush.bf16.msrb.mxu0 %v1008_v39 }
 0x3c8   :  { %1024 = vmatmul.bf16.vlgmr.msrb.gmra.mxu0 %v1558_v51  ;;  %v855_v51 = vpack.c.bf16 %v841_v49, %v839_v28 }
 0x3ca   :  { %965 = vmatmul.bf16.gmra.mxu2 %v855_v51  ;;  %v948_v60 = vpop.f32.mrf.mxu2 }
 0x3d2   :  { %v951_v61 = vpop.f32.mrf.mxu2 }
 0x3da   :  { %970 = vmatmul.bf16.gmra.mxu2 %v856_v54  ;;  %v953_v62 = vpop.f32.mrf.mxu2 }
 0x3e2   :  { %v956_v63 = vpop.f32.mrf.mxu2 }
 0x3ea   :  { %v958_v0 = vpop.f32.mrf.mxu2 }
 0x3f2   :  { %v961_v1 = vpop.f32.mrf.mxu2 }
 0x3fa   :  { %v963_v2 = vpop.f32.mrf.mxu2 }
 0x445   :  { %v1025_v56 = vpop.f32.mrf.mxu0 }
 0x446   :  { %1062 = vmatmul.f32.vlgmr.msrb.gmra.mxu3 %v1025_v56 }
 0x44d   :  { %v1027_v59 = vpop.f32.mrf.mxu0  ;;  %v966_v58 = vpop.f32.mrf.mxu2 }
 0x455   :  { %v968_v3 = vpop.f32.mrf.mxu2 }
 0x45d   :  { %v971_v4 = vpop.f32.mrf.mxu2 }
 0x465   :  { %v973_v5 = vpop.f32.mrf.mxu2 }
 0x4c9   :  { %v1063_v9 = vpop.f32.mrf.mxu3 }
 0x4ca   :  { %v1066_v10 = vadd.f32 %v1063_v9, %v799_v8 }
 0x4cc   :  { %v1067_v11 = vmax.f32 %v1066_v10, 0.0 }
 0x4ce   :  { %1068 = vst [vmem:[#allocation11] sm:$0xff] %v1067_v11 }
 0x4cf   :  { %1079 = dma.vmem_to_hbm [thread:$0]  %s1075_s10, 128, %s1077_s13, [#allocation4]  }
 0x4d0   :  { %1464 = dma.done.wait [#allocation4], 128  }
 0x4d1   :  { %1465 = vsyncadd [#allocation4], 4294967168 }
 0x4d2   :  { %1084 = vsyncpa [#allocation3], 1 }
 0x4d3   :  { %1085 = vsyncpa [#allocation6], 1 }
 0x4d4   :  { %1086 = vsyncpa [#allocation9], 1 }
 0x4d5   :  { %1087 = vsyncpa [#allocation4], 1 }

</bundles_post_ra>
